<compile_context>
chip_gen: v7x
topology: tpu7x:2x2x1
jax: 0.10.0
libtpu: 0.0.40
codegen_flags: <defaults>
</compile_context>

<pallas_src>
import jax
import jax.numpy as jnp
from jax.experimental import pallas as pl
from jax.experimental.pallas import tpu as pltpu


def _round_up(n: int, m: int) -> int:
    return ((n + m - 1) // m) * m


def _cdiv(a: int, b: int) -> int:
    return (a + b - 1) // b


# Sublane multiple by element size (packed layouts for sub-32-bit dtypes).
_SUBLANE_BY_ITEMSIZE = {4: 8, 2: 16, 1: 32}


def _default_block_b() -> int:
    """128 on v5e (128x128 MXU, tighter scoped VMEM), 256 on v6e/v7x."""
    try:
        kind = jax.devices()[0].device_kind.lower()
    except Exception:  # pragma: no cover
        return 256
    if "v5 lite" in kind or "v5e" in kind or "v5lite" in kind:
        return 128
    return 256


# -----------------------------------------------------------------------------
# One-time (model-load) parameter preparation.  Do NOT call this per forward:
# it pads/copies the weights in HBM.
# -----------------------------------------------------------------------------
def prepare_head_params(w_dense, b_dense, w_out, b_out, *, compute_dtype=None):
    """Pad weights/biases to 128-lane multiples, reshape biases to [1, *], and
    optionally cast weights to a narrower MXU streaming dtype (e.g. bf16).

    w_dense: [H, H] (in, out), b_dense: [H], w_out: [H, L] (in, out), b_out: [L].
    Zero padding is numerically exact (padded rows/cols contribute 0).
    """
    H, H2 = w_dense.shape
    assert H == H2, "dense weight must be square [hidden, hidden]"
    L = w_out.shape[1]
    Hp = _round_up(H, 128)
    Lp = _round_up(L, 128)
    wdt = jnp.dtype(compute_dtype) if compute_dtype is not None else jnp.dtype(w_dense.dtype)

    w1 = jnp.pad(jnp.asarray(w_dense, wdt), ((0, Hp - H), (0, Hp - H)))
    w2 = jnp.pad(jnp.asarray(w_out, wdt), ((0, Hp - H), (0, Lp - L)))
    # Biases stay f32: they are added to f32 accumulators and are tiny.
    b1 = jnp.pad(jnp.asarray(b_dense, jnp.float32), (0, Hp - H)).reshape(1, Hp)
    b2 = jnp.pad(jnp.asarray(b_out, jnp.float32), (0, Lp - L)).reshape(1, Lp)

    return {"w1": w1, "b1": b1, "w2": w2, "b2": b2,
            "hidden_size": H, "num_labels": L}


# -----------------------------------------------------------------------------
# Kernel
# -----------------------------------------------------------------------------
def _head_kernel(x_ref, w1_ref, b1_ref, w2_ref, b2_ref, o_ref):
    # x_ref:  [TB, Hp]   CLS-token features tile
    # w1_ref: [Hp, Hp]   dense weight (in, out)      -- VMEM-resident, 1 buffer
    # b1_ref: [1, Hp]    dense bias (f32)
    # w2_ref: [Hp, Lp]   out_proj weight (in, out)   -- VMEM-resident, 1 buffer
    # b2_ref: [1, Lp]    out_proj bias (f32)
    # o_ref:  [TB, Lp]   f32 logits tile (lane-dense)
    x = x_ref[...].astype(w1_ref.dtype)          # stream x at the weight dtype
    h = jnp.dot(x, w1_ref[...], preferred_element_type=jnp.float32)
    h = jnp.tanh(h + b1_ref[...])
    # TODO(synk): dropout is identity in eval mode; training-mode dropout would
    # use pltpu.prng_seed + pltpu.prng_random_bits.
    h = h.astype(w2_ref.dtype)
    out = jnp.dot(h, w2_ref[...], preferred_element_type=jnp.float32)
    o_ref[...] = (out + b2_ref[...]).astype(o_ref.dtype)


# -----------------------------------------------------------------------------
# Forward
# -----------------------------------------------------------------------------
def bert_classification_head(features, params, *, block_b=None,
                             small_batch_fallback: int = 32,
                             out_dtype=jnp.float32):
    """features: [B, S, H]; params from prepare_head_params(); returns [B, L] f32."""
    w1, b1, w2, b2 = params["w1"], params["b1"], params["w2"], params["b2"]
    H, L = params["hidden_size"], params["num_labels"]
    Hp, Lp = w1.shape[1], w2.shape[1]
    B, S, _ = features.shape

    # Tiny batch: the fixed pallas_call + weight-DMA overhead dominates; XLA's
    # fused dot does the same math (on the already-prepared padded params).
    if B <= small_batch_fallback:
        x = features[:, 0, :]
        if Hp != H:
            x = jnp.pad(x, ((0, 0), (0, Hp - H)))
        x = x.astype(w1.dtype)
        h = jnp.tanh(jnp.dot(x, w1, preferred_element_type=jnp.float32) + b1)
        out = jnp.dot(h.astype(w2.dtype), w2, preferred_element_type=jnp.float32) + b2
        return out[:, :L].astype(out_dtype)

    if block_b is None:
        block_b = _default_block_b()

    sublane = _SUBLANE_BY_ITEMSIZE.get(jnp.dtype(features.dtype).itemsize, 8)
    # Pick number of tiles first, then round the tile to the sublane multiple,
    # so batch padding is bounded by (sublane-1) per tile (not up to ~2x B).
    n_tiles = _cdiv(B, block_b)
    if B >= 256:
        n_tiles = max(n_tiles, 2)     # >= 2 grid steps: pipelining + v7x megacore
    TB = _round_up(_cdiv(B, n_tiles), sublane)
    Bp = n_tiles * TB

    if Bp == B and Hp == H:
        # Aligned: fold the CLS (seq=0) selection into a strided 3-D BlockSpec;
        # no activation copy is materialized in HBM.
        x_op = features
        x_spec = pl.BlockSpec((TB, pl.Squeezed(), Hp), lambda i: (i, 0, 0))
    else:
        # Slice CLS first (B*H elements, not B*S*H), then pad the tiny 2-D slab.
        x_cls = features[:, 0, :]
        x_op = jnp.pad(x_cls, ((0, Bp - B), (0, Hp - H)))
        x_spec = pl.BlockSpec((TB, Hp), lambda i: (i, 0))

    const2 = lambda i: (0, 0)
    single = pl.Buffered(1)   # constant block index -> one VMEM buffer is enough
    weight_specs = [
        pl.BlockSpec((Hp, Hp), const2, pipeline_mode=single),
        pl.BlockSpec((1, Hp), const2, pipeline_mode=single),
        pl.BlockSpec((Hp, Lp), const2, pipeline_mode=single),
        pl.BlockSpec((1, Lp), const2, pipeline_mode=single),
    ]

    x_bytes = jnp.dtype(features.dtype).itemsize
    w_bytes = jnp.dtype(w1.dtype).itemsize
    cost = pl.CostEstimate(
        flops=2 * Bp * Hp * Hp + 2 * Bp * Hp * Lp,
        transcendentals=Bp * Hp,
        bytes_accessed=(Bp * Hp * x_bytes
                        + (Hp * Hp + Hp * Lp) * w_bytes
                        + (Hp + Lp) * 4
                        + Bp * Lp * jnp.dtype(out_dtype).itemsize),
    )

    out = pl.pallas_call(
        _head_kernel,
        out_shape=jax.ShapeDtypeStruct((Bp, Lp), out_dtype),
        grid_spec=pltpu.PrefetchScalarGridSpec(
            num_scalar_prefetch=0,
            grid=(Bp // TB,),
            in_specs=[x_spec] + weight_specs,
            out_specs=pl.BlockSpec((TB, Lp), lambda i: (i, 0)),
        ),
        compiler_params=pltpu.CompilerParams(
            # "parallel" lets v7x's two TensorCores split the batch axis
            # (swap to pltpu.CORE_PARALLEL if profiling shows no split).
            dimension_semantics=("parallel",),
            vmem_limit_bytes=32 * 1024 * 1024,
        ),
        cost_estimate=cost,
    )(x_op, w1, b1, w2, b2)

    return out[:B, :L]


# -----------------------------------------------------------------------------
# Demo / correctness check
# -----------------------------------------------------------------------------
if __name__ == "__main__":
    def make_inputs(key, B, S, H, L):
        k1, k2, k3, k4, k5 = jax.random.split(key, 5)
        features = jax.random.normal(k1, (B, S, H), dtype=jnp.float32)
        w_dense = jax.random.normal(k2, (H, H), dtype=jnp.float32) * 0.02
        b_dense = jax.random.normal(k3, (H,), dtype=jnp.float32) * 0.02
        w_out = jax.random.normal(k4, (H, L), dtype=jnp.float32) * 0.02
        b_out = jax.random.normal(k5, (L,), dtype=jnp.float32) * 0.02
        return features, w_dense, b_dense, w_out, b_out

    def reference(features, w_dense, b_dense, w_out, b_out):
        x = features[:, 0, :].astype(jnp.float32)
        return jnp.tanh(x @ w_dense + b_dense) @ w_out + b_out

    ok = True

    # 1) Small / unaligned shape (H=32 -> CLS-slice + 2-D pad path), f32 weights,
    #    Pallas kernel forced on (fallback disabled).
    B, S, H, L = 2, 8, 32, 4
    feats, wd, bd, wo, bo = make_inputs(jax.random.PRNGKey(0), B, S, H, L)
    params_f32 = prepare_head_params(wd, bd, wo, bo)          # model-load time
    logits = bert_classification_head(feats, params_f32, small_batch_fallback=0)
    logits = jax.block_until_ready(logits)
    ref = reference(feats, wd, bd, wo, bo)
    assert logits.shape == (B, L) and logits.dtype == jnp.float32
    ok &= bool(jnp.allclose(logits, ref, atol=1e-5, rtol=1e-5))

    # 2) Same inputs through the small-batch XLA fallback (default threshold).
    logits_fb = jax.block_until_ready(bert_classification_head(feats, params_f32))
    ok &= bool(jnp.allclose(logits_fb, ref, atol=1e-5, rtol=1e-5))

    # 3) Lane-aligned shape (H=128 -> zero-copy strided 3-D CLS BlockSpec) with
    #    bf16 weight streaming + f32 accumulation.
    B2, S2, H2, L2 = 8, 4, 128, 4
    feats2, wd2, bd2, wo2, bo2 = make_inputs(jax.random.PRNGKey(1), B2, S2, H2, L2)
    params_bf16 = prepare_head_params(wd2, bd2, wo2, bo2, compute_dtype=jnp.bfloat16)
    logits2 = bert_classification_head(feats2, params_bf16, small_batch_fallback=0)
    logits2 = jax.block_until_ready(logits2)
    ref2 = reference(feats2, wd2, bd2, wo2, bo2)
    assert logits2.shape == (B2, L2)
    ok &= bool(jnp.allclose(logits2, ref2, atol=5e-3, rtol=5e-2))

    if ok:
        print("KERNEL_OK")
    else:
        raise SystemExit("mismatch vs reference")
</pallas_src>

<mosaic_0001>
module attributes {stable_mosaic.version = 11 : i64} {
  func.func @_head_kernel(%arg0: i32, %arg1: memref<8x128xf32, #tpu.memory_space<vmem>>, %arg2: memref<128x128xf32, #tpu.memory_space<vmem>>, %arg3: memref<1x128xf32, #tpu.memory_space<vmem>>, %arg4: memref<128x128xf32, #tpu.memory_space<vmem>>, %arg5: memref<1x128xf32, #tpu.memory_space<vmem>>, %arg6: memref<8x128xf32, #tpu.memory_space<vmem>>) attributes {dimension_semantics = [#tpu.dimension_semantics<parallel>], iteration_bounds = array<i64: 1>, scalar_prefetch = 0 : i64, scratch_operands = 0 : i64, tpu.core_type = #tpu.core_type<tc>, window_params = [{transform_indices = @transform_0, window_bounds = array<i64: 8, 128>}, {pipeline_mode = #tpu.pipeline_mode<synchronous>, transform_indices = @transform_1, window_bounds = array<i64: 128, 128>}, {pipeline_mode = #tpu.pipeline_mode<synchronous>, transform_indices = @transform_2, window_bounds = array<i64: 1, 128>}, {pipeline_mode = #tpu.pipeline_mode<synchronous>, transform_indices = @transform_3, window_bounds = array<i64: 128, 128>}, {pipeline_mode = #tpu.pipeline_mode<synchronous>, transform_indices = @transform_4, window_bounds = array<i64: 1, 128>}, {transform_indices = @transform_5, window_bounds = array<i64: 8, 128>}]} {
    %c0 = arith.constant 0 : index
    %c0_0 = arith.constant 0 : index
    %0 = vector.load %arg1[%c0, %c0_0] : memref<8x128xf32, #tpu.memory_space<vmem>>, vector<8x128xf32>
    %c0_1 = arith.constant 0 : index
    %c0_2 = arith.constant 0 : index
    %1 = vector.load %arg2[%c0_1, %c0_2] : memref<128x128xf32, #tpu.memory_space<vmem>>, vector<128x128xf32>
    %cst = arith.constant dense<0.000000e+00> : vector<8x128xf32>
    %2 = tpu.matmul %0, %1, %cst {dimension_numbers = #tpu.dot_dimension_numbers<[1], [0], [0], [1], [0, 0, 1, 1], [], []>} : vector<8x128xf32>, vector<128x128xf32>, vector<8x128xf32> -> vector<8x128xf32>
    %c0_3 = arith.constant 0 : index
    %c0_4 = arith.constant 0 : index
    %3 = vector.load %arg3[%c0_3, %c0_4] : memref<1x128xf32, #tpu.memory_space<vmem>>, vector<1x128xf32>
    %4 = vector.broadcast %3 : vector<1x128xf32> to vector<8x128xf32>
    %5 = arith.addf %2, %4 : vector<8x128xf32>
    %6 = math.tanh %5 : vector<8x128xf32>
    %c0_5 = arith.constant 0 : index
    %c0_6 = arith.constant 0 : index
    %7 = vector.load %arg4[%c0_5, %c0_6] : memref<128x128xf32, #tpu.memory_space<vmem>>, vector<128x128xf32>
    %cst_7 = arith.constant dense<0.000000e+00> : vector<8x128xf32>
    %8 = tpu.matmul %6, %7, %cst_7 {dimension_numbers = #tpu.dot_dimension_numbers<[1], [0], [0], [1], [0, 0, 1, 1], [], []>} : vector<8x128xf32>, vector<128x128xf32>, vector<8x128xf32> -> vector<8x128xf32>
    %c0_8 = arith.constant 0 : index
    %c0_9 = arith.constant 0 : index
    %9 = vector.load %arg5[%c0_8, %c0_9] : memref<1x128xf32, #tpu.memory_space<vmem>>, vector<1x128xf32>
    %10 = vector.broadcast %9 : vector<1x128xf32> to vector<8x128xf32>
    %11 = arith.addf %8, %10 : vector<8x128xf32>
    %c0_10 = arith.constant 0 : index
    %c0_11 = arith.constant 0 : index
    %12 = vector.load %arg6[%c0_10, %c0_11] : memref<8x128xf32, #tpu.memory_space<vmem>>, vector<8x128xf32>
    tpu.vector_store %arg6[%c0_10, %c0_11], %11 {strides = array<i32>} : memref<8x128xf32, #tpu.memory_space<vmem>>, vector<8x128xf32>,
    return
  }
  func.func @transform_0(%arg0: i32) -> (i32, i32) {
    %c0_i32 = arith.constant 0 : i32
    %c0_i32_0 = arith.constant 0 : i32
    return %arg0, %c0_i32 : i32, i32
  }
  func.func @transform_1(%arg0: i32) -> (i32, i32) {
    %c0_i32 = arith.constant 0 : i32
    %c0_i32_0 = arith.constant 0 : i32
    %c0_i32_1 = arith.constant 0 : i32
    return %c0_i32, %c0_i32_0 : i32, i32
  }
  func.func @transform_2(%arg0: i32) -> (i32, i32) {
    %c0_i32 = arith.constant 0 : i32
    %c0_i32_0 = arith.constant 0 : i32
    %c0_i32_1 = arith.constant 0 : i32
    return %c0_i32, %c0_i32_0 : i32, i32
  }
  func.func @transform_3(%arg0: i32) -> (i32, i32) {
    %c0_i32 = arith.constant 0 : i32
    %c0_i32_0 = arith.constant 0 : i32
    %c0_i32_1 = arith.constant 0 : i32
    return %c0_i32, %c0_i32_0 : i32, i32
  }
  func.func @transform_4(%arg0: i32) -> (i32, i32) {
    %c0_i32 = arith.constant 0 : i32
    %c0_i32_0 = arith.constant 0 : i32
    %c0_i32_1 = arith.constant 0 : i32
    return %c0_i32, %c0_i32_0 : i32, i32
  }
  func.func @transform_5(%arg0: i32) -> (i32, i32) {
    %c0_i32 = arith.constant 0 : i32
    %c0_i32_0 = arith.constant 0 : i32
    return %arg0, %c0_i32 : i32, i32
  }
}

</mosaic_0001>

<bundles_post_ra>
// kernel: tpu_custom_call.1
= control target key start
LH: loop header
LB: loop body
LE: loop exit
PB: predicated region body
PF: predicated region fallthrough
CT: control target
= control target key end

     0   :  { %10 = vsyncpa [#allocation3], 0  ;;  %s639_s0 = inlined_call_operand.hbm [shape: f32[8,128], index: 0, kind: input, shape index: {}]   ;;  %s640_s1 = inlined_call_operand.hbm [shape: f32[128,128], index: 1, kind: input, shape index: {}]   ;;  %s641_s2 = inlined_call_operand.vmem [shape: f32[1,128], index: 2, kind: input, shape index: {}]   ;;  %s642_s3 = inlined_call_operand.hbm [shape: f32[128,128], index: 3, kind: input, shape index: {}]   ;;  %s643_s4 = inlined_call_operand.vmem [shape: f32[1,128], index: 4, kind: input, shape index: {}]   ;;  %s644_s5 = inlined_call_operand.hbm [shape: f32[8,128], index: 5, kind: output, shape index: {}]  }
   0x1   :  { %11 = vsyncpa [#allocation6], 0 }
   0x2   :  { %12 = vsyncpa [#allocation4], 0  ;;  %s524_s18 = smov [#allocation5]   ;;  %s430_s22 = scalar_lea.hbm %s640_s1, 2048 }
   0x3   :  { %s28_s19 = sshll.u32 %s524_s18, 4  ;;  %p431_p0 = scmp.ne.s32.totalorder %s640_s1, %s430_s22  ;;  %s29_s19 = int_to_ptr.vmem [resolvable:$true] %s28_s19 }
   0x4   :  { %p434_p1 = scmp.lt.u32.totalorder %s430_s22, %s640_s1 }
   0x6   :  { %p436_p2 = pnand %p434_p1, %p431_p0 }
   0x8   :  { %439 = shalt.err (!%p436_p2)
}
   0x9   :  { %s440_s27 = scalar_lea.vmem %s29_s19, 2048  ;;  %p445_p4 = scmp.lt.s32.totalorder %s29_s19, %s29_s19 }
   0xa   :  { %p441_p3 = scmp.ne.s32.totalorder %s29_s19, %s440_s27  ;;  %p446_p5 = scmp.lt.s32.totalorder %s440_s27, %s440_s27 }
   0xc   :  { %p447_p6 = por %p446_p5, %p445_p4 }
   0xe   :  { %p448_p7 = pnand %p447_p6, %p441_p3 }
  0x10   :  { %451 = shalt.err (!%p448_p7)
}
  0x11   :  { %s525_s28 = smov 128   ;;  %s526_s29 = smov 8  }
  0x12   :  { %34 = dma.hbm_to_vmem [thread:$0]  %s640_s1, 2048, %s29_s19, [#allocation6], %s525_s28, %s525_s28, %s526_s29  }
  0x13   :  { %s527_s7 = smov [#allocation2]   ;;  %s528_s9 = smov [#allocation7]  }
  0x14   :  { %s19_s8 = sshll.u32 %s527_s7, 4  ;;  %s42_s10 = sshll.u32 %s528_s9, 4  ;;  %s20_s8 = int_to_ptr.vmem [resolvable:$true] %s19_s8  ;;  %s43_s10 = int_to_ptr.vmem [resolvable:$true] %s42_s10 }
  0x15   :  { %s452_s13 = scalar_lea.hbm %s639_s0, 128 }
  0x16   :  { %p453_p8 = scmp.ne.s32.totalorder %s639_s0, %s452_s13  ;;  %p456_p9 = scmp.lt.u32.totalorder %s452_s13, %s639_s0 }
  0x18   :  { %p458_p10 = pnand %p456_p9, %p453_p8 }
  0x1a   :  { %461 = shalt.err (!%p458_p10)
}
  0x1b   :  { %s462_s1 = scalar_lea.vmem %s20_s8, 128  ;;  %p467_p12 = scmp.lt.s32.totalorder %s20_s8, %s20_s8 }
  0x1c   :  { %p463_p11 = scmp.ne.s32.totalorder %s20_s8, %s462_s1  ;;  %p468_p13 = scmp.lt.s32.totalorder %s462_s1, %s462_s1 }
  0x1e   :  { %p469_p0 = por %p468_p13, %p467_p12 }
  0x20   :  { %p470_p1 = pnand %p469_p0, %p463_p11 }
  0x22   :  { %473 = shalt.err (!%p470_p1)
}
  0x23   :  { %22 = dma.hbm_to_vmem [thread:$0]  %s639_s0, 128, %s20_s8, [#allocation3]  }
  0x24   :  { %s474_s22 = scalar_lea.hbm %s642_s3, 2048 }
  0x25   :  { %p475_p2 = scmp.ne.s32.totalorder %s642_s3, %s474_s22  ;;  %p478_p3 = scmp.lt.u32.totalorder %s474_s22, %s642_s3 }
  0x27   :  { %p480_p4 = pnand %p478_p3, %p475_p2 }
  0x29   :  { %483 = shalt.err (!%p480_p4)
}
  0x2a   :  { %s484_s27 = scalar_lea.vmem %s43_s10, 2048  ;;  %p489_p6 = scmp.lt.s32.totalorder %s43_s10, %s43_s10 }
  0x2b   :  { %p485_p5 = scmp.ne.s32.totalorder %s43_s10, %s484_s27  ;;  %p490_p7 = scmp.lt.s32.totalorder %s484_s27, %s484_s27 }
  0x2d   :  { %p491_p8 = por %p490_p7, %p489_p6 }
  0x2f   :  { %p492_p9 = pnand %p491_p8, %p485_p5 }
  0x31   :  { %495 = shalt.err (!%p492_p9)
}
  0x32   :  { %48 = dma.hbm_to_vmem [thread:$0]  %s642_s3, 2048, %s43_s10, [#allocation6], %s525_s28, %s525_s28, %s526_s29  }
  0x33   :  { %518 = dma.done.wait [#allocation3], 128  }
  0x34   :  { %519 = vsyncadd [#allocation3], 4294967168 }
  0x35   :  { %520 = dma.done.wait [#allocation6], 4096  }
  0x36   :  { %521 = vsyncadd [#allocation6], 4294963200  ;;  %v529_v0 = vmov 0.0|0.0   ;;  %vm530_vm0 = vmmov 0   ;;  %v531_v1 = vmov 0.0   ;;  %v61_v2 = vld [vmem:[#allocation5] sm:$0xff] }
  0x37   :  { %371 = vmatprep.subr.bf16.mxu0 %v529_v0  ;;  %333 = vmatprep.mubr.msk.f32.mxu0 %vm530_vm0, %v531_v1  ;;  %v62_v3 = vld [vmem:[#allocation5 + $0x8] sm:$0xff]  ;;  %v63_v4 = vld [vmem:[#allocation5 + $0x10] sm:$0xff]  ;;  %v64_v6 = vld [vmem:[#allocation5 + $0x18] sm:$0xff]  ;;  %s532_s7 = smov [#allocation8]  }
  0x38   :  { %395 = vmatprep.subr.bf16.mxu1 %v529_v0  ;;  %368 = vmatprep.mubr.msk.f32.mxu1 %vm530_vm0, %v531_v1  ;;  %v372_v5 = vpack.c.bf16 %v62_v3, %v61_v2  ;;  %v375_v7 = vpack.c.bf16 %v64_v6, %v63_v4  ;;  %v65_v8 = vld [vmem:[#allocation5 + $0x20] sm:$0xff]  ;;  %v66_v9 = vld [vmem:[#allocation5 + $0x28] sm:$0xff]  ;;  %v157_v12 = vld [vmem:[#allocation7 + $0x10] sm:$0xff]  ;;  %s255_s8 = sshll.u32 %s532_s7, 4  ;;  %s256_s8 = int_to_ptr.vmem [resolvable:$true] %s255_s8 }
  0x39   :  { %v155_v10 = vld [vmem:[#allocation7] sm:$0xff]  ;;  %v156_v11 = vld [vmem:[#allocation7 + $0x8] sm:$0xff]  ;;  %v158_v13 = vld [vmem:[#allocation7 + $0x18] sm:$0xff]  ;;  %v378_v14 = vpack.c.bf16 %v66_v9, %v65_v8  ;;  %s496_s9 = scalar_lea.vmem %s256_s8, 128  ;;  %p501_p11 = scmp.lt.s32.totalorder %s256_s8, %s256_s8 }
  0x3a   :  { %373 = vmatpush3.bf16.msra.mxu0 %v372_v5  ;;  %v396_v15 = vpack.c.bf16 %v156_v11, %v155_v10  ;;  %v67_v16 = vld [vmem:[#allocation5 + $0x30] sm:$0xff]  ;;  %v68_v17 = vld [vmem:[#allocation5 + $0x38] sm:$0xff]  ;;  %v399_v18 = vpack.c.bf16 %v158_v13, %v157_v12  ;;  %v159_v19 = vld [vmem:[#allocation7 + $0x20] sm:$0xff]  ;;  %p497_p10 = scmp.ne.s32.totalorder %s256_s8, %s496_s9  ;;  %p502_p12 = scmp.lt.s32.totalorder %s496_s9, %s496_s9 }
  0x3b   :  { %374 = vmatprep.subr.bf16.mxu0 %v529_v0  ;;  %v160_v20 = vld [vmem:[#allocation7 + $0x28] sm:$0xff]  ;;  %v381_v21 = vpack.c.bf16 %v68_v17, %v67_v16  ;;  %v69_v22 = vld [vmem:[#allocation5 + $0x40] sm:$0xff]  ;;  %v161_v25 = vld [vmem:[#allocation7 + $0x30] sm:$0xff] }
  0x3c   :  { %397 = vmatpush3.bf16.msra.mxu1 %v396_v15  ;;  %v70_v23 = vld [vmem:[#allocation5 + $0x48] sm:$0xff]  ;;  %v402_v24 = vpack.c.bf16 %v160_v20, %v159_v19  ;;  %v162_v26 = vld [vmem:[#allocation7 + $0x38] sm:$0xff]  ;;  %v71_v28 = vld [vmem:[#allocation5 + $0x50] sm:$0xff]  ;;  %p503_p13 = por %p502_p12, %p501_p11 }
  0x3d   :  { %398 = vmatprep.subr.bf16.mxu1 %v529_v0  ;;  %v384_v27 = vpack.c.bf16 %v70_v23, %v69_v22  ;;  %v72_v29 = vld [vmem:[#allocation5 + $0x58] sm:$0xff]  ;;  %v405_v30 = vpack.c.bf16 %v162_v26, %v161_v25  ;;  %v163_v31 = vld [vmem:[#allocation7 + $0x40] sm:$0xff]  ;;  %v164_v32 = vld [vmem:[#allocation7 + $0x48] sm:$0xff] }
  0x3e   :  { %376 = vmatpush3.bf16.msra.mxu0 %v375_v7  ;;  %v387_v33 = vpack.c.bf16 %v72_v29, %v71_v28  ;;  %v73_v34 = vld [vmem:[#allocation5 + $0x60] sm:$0xff]  ;;  %v74_v35 = vld [vmem:[#allocation5 + $0x68] sm:$0xff]  ;;  %v408_v36 = vpack.c.bf16 %v164_v32, %v163_v31  ;;  %v75_v38 = vld [vmem:[#allocation5 + $0x70] sm:$0xff]  ;;  %p504_p0 = pnand %p503_p13, %p497_p10 }
  0x3f   :  { %377 = vmatprep.subr.bf16.mxu0 %v529_v0  ;;  %v390_v37 = vpack.c.bf16 %v74_v35, %v73_v34  ;;  %v76_v39 = vld [vmem:[#allocation5 + $0x78] sm:$0xff]  ;;  %v165_v42 = vld [vmem:[#allocation7 + $0x50] sm:$0xff]  ;;  %v167_v45 = vld [vmem:[#allocation7 + $0x60] sm:$0xff] }
  0x40   :  { %400 = vmatpush3.bf16.msra.mxu1 %v399_v18  ;;  %v393_v40 = vpack.c.bf16 %v76_v39, %v75_v38  ;;  %v60_v41 = vld [vmem:[#allocation2] sm:$0xff]  ;;  %v168_v46 = vld [vmem:[#allocation7 + $0x68] sm:$0xff]  ;;  %v169_v48 = vld [vmem:[#allocation7 + $0x70] sm:$0xff] }
  0x41   :  { %401 = vmatprep.subr.bf16.mxu1 %v529_v0  ;;  %v166_v43 = vld [vmem:[#allocation7 + $0x58] sm:$0xff]  ;;  %v414_v47 = vpack.c.bf16 %v168_v46, %v167_v45 }
  0x42   :  { %379 = vmatpush3.bf16.msra.mxu0 %v378_v14  ;;  %v411_v44 = vpack.c.bf16 %v166_v43, %v165_v42  ;;  %v170_v49 = vld [vmem:[#allocation7 + $0x78] sm:$0xff] }
  0x43   :  { %380 = vmatprep.subr.bf16.mxu0 %v529_v0  ;;  %v417_v50 = vpack.c.bf16 %v170_v49, %v169_v48  ;;  %v265_v51 = vld [vmem:[%s641_s2] ss:$0 sm:$0xff] }
  0x44   :  { %403 = vmatpush3.bf16.msra.mxu1 %v402_v24  ;;  %v266_v56 = vld [vmem:[%s643_s4] ss:$0 sm:$0xff] }
  0x45   :  { %404 = vmatprep.subr.bf16.mxu1 %v529_v0 }
  0x46   :  { %382 = vmatpush3.bf16.msra.mxu0 %v381_v21 }
  0x47   :  { %383 = vmatprep.subr.bf16.mxu0 %v529_v0 }
  0x48   :  { %406 = vmatpush3.bf16.msra.mxu1 %v405_v30 }
  0x49   :  { %407 = vmatprep.subr.bf16.mxu1 %v529_v0 }
  0x4a   :  { %385 = vmatpush3.bf16.msra.mxu0 %v384_v27 }
  0x4b   :  { %386 = vmatprep.subr.bf16.mxu0 %v529_v0 }
  0x4c   :  { %409 = vmatpush3.bf16.msra.mxu1 %v408_v36 }
  0x4d   :  { %410 = vmatprep.subr.bf16.mxu1 %v529_v0 }
  0x4e   :  { %388 = vmatpush3.bf16.msra.mxu0 %v387_v33 }
  0x4f   :  { %389 = vmatprep.subr.bf16.mxu0 %v529_v0 }
  0x50   :  { %412 = vmatpush3.bf16.msra.mxu1 %v411_v44 }
  0x51   :  { %413 = vmatprep.subr.bf16.mxu1 %v529_v0 }
  0x52   :  { %391 = vmatpush3.bf16.msra.mxu0 %v390_v37 }
  0x53   :  { %392 = vmatprep.subr.bf16.mxu0 %v529_v0 }
  0x54   :  { %415 = vmatpush3.bf16.msra.mxu1 %v414_v47 }
  0x55   :  { %416 = vmatprep.subr.bf16.mxu1 %v529_v0 }
  0x56   :  { %394 = vmatpush3.bf16.msra.mxu0 %v393_v40 }
  0x58   :  { %418 = vmatpush3.bf16.msra.mxu1 %v417_v50 }
  0x59   :  { %334 = vmatmul.mubr.f32.vlgmr.msra.gmra.mrb[0].mxu0 %v60_v41 }
 0x12c   :  { %v150_v52 = vpop.f32.mrb[0].mxu0 }
 0x12d   :  { %v151_v53 = vadd.f32 %v265_v51, %v150_v52  ;;  %v335_v54 = vpop.f32.mrb[1].mxu0 }
 0x12f   :  { %428 = vtanh.f32 %v151_v53 }
 0x139   :  { %v429_v55 = vpop.eup %428 }
 0x13a   :  { %369 = vmatmul.mubr.f32.vlgmr.msra.gmra.mrb[0].mxu1 %v429_v55 }
 0x20d   :  { %v244_v57 = vpop.f32.mrb[0].mxu1 }
 0x20e   :  { %v245_v58 = vadd.f32 %v266_v56, %v244_v57  ;;  %v370_v59 = vpop.f32.mrb[1].mxu1 }
 0x210   :  { %248 = vst [vmem:[#allocation8] sm:$0xff] %v245_v58 }
 0x211   :  { %507 = shalt.err (!%p504_p0)
}
 0x212   :  { %s508_s11 = scalar_lea.hbm %s644_s5, 128 }
 0x213   :  { %p509_p1 = scmp.ne.s32.totalorder %s644_s5, %s508_s11  ;;  %p512_p2 = scmp.lt.u32.totalorder %s508_s11, %s644_s5 }
 0x215   :  { %p514_p3 = pnand %p512_p2, %p509_p1 }
 0x217   :  { %517 = shalt.err (!%p514_p3)
}
 0x218   :  { %258 = dma.vmem_to_hbm [thread:$0]  %s256_s8, 128, %s644_s5, [#allocation4]  }
 0x219   :  { %522 = dma.done.wait [#allocation4], 128  }
 0x21a   :  { %523 = vsyncadd [#allocation4], 4294967168 }
 0x21b   :  { %262 = vsyncpa [#allocation3], 1 }
 0x21c   :  { %263 = vsyncpa [#allocation6], 1 }
 0x21d   :  { %264 = vsyncpa [#allocation4], 1 }

</bundles_post_ra>
